<compile_context>
chip_gen: v7x
topology: tpu7x:2x2x1
jax: 0.10.0
libtpu: 0.0.40
codegen_flags: <defaults>
</compile_context>

<pallas_src>
import functools

import numpy as np
import jax
import jax.numpy as jnp
from jax import lax
from jax.experimental import pallas as pl
from jax.experimental.pallas import tpu as pltpu

X_LEN = 0.2
Y_LEN = 0.4


def _gen_loss_kernel(col_ref, hr_ref, img_ref, drho_ref,
                     losses_ref, res_t_ref, res_ref, *, H, W):
    """Single full-array block.  Field refs use the flattened (..., H*W) layout.

    col_ref    : (1, H*W)   int32  column index (flat_idx % W), host-precomputed
    hr_ref     : (B, C, H*W) f32   hr_est
    img_ref    : (B, C, H*W) f32   hr_img
    drho_ref   : (B, H*W)    f32   dvar_dt channel 0
    losses_ref : (3,)        f32   SMEM  [image_loss, physics_loss_norm, tv_loss]
    res_t_ref  : (B, H*W)    f32   residual_t
    res_ref    : (B, H*W)    f32   residual
    """
    HW = H * W
    hr = hr_ref[...]
    img = img_ref[...]
    B, C, _ = hr.shape

    # One (1, HW) index row drives every edge mask (broadcast in the selects).
    col = col_ref[...]                                    # flat_idx % W
    flat = lax.broadcasted_iota(jnp.int32, (1, HW), 1)    # flat index
    is_first_col = col == 0
    is_last_col = col == (W - 1)
    is_first_row = flat < W
    is_last_row = flat >= (H - 1) * W

    # ---------------- image loss: MSE(hr_est, hr_img) -----------------------
    d = hr - img
    losses_ref[0] = jnp.mean(d * d)

    # ---------------- TV loss (tv_loss_weight = 1) --------------------------
    # Flattened layout:  x[h+1,w]-x[h,w] == roll(-W) - x   (mask last row)
    #                    x[h,w+1]-x[h,w] == roll(-1) - x   (mask last col)
    # pltpu.roll runs in the XLU slot and stays full-vreg-width; edge handling
    # is a full-width select instead of narrow slices + concatenate.
    right = pltpu.roll(hr, shift=HW - 1, axis=2)    # hr[..., i+1] (wrap masked out)
    down = pltpu.roll(hr, shift=HW - W, axis=2)     # hr[..., i+W] (wrap masked out)
    w_d = jnp.where(is_last_col[:, None, :], 0.0, right - hr)
    h_d = jnp.where(is_last_row[:, None, :], 0.0, down - hr)
    h_tv = jnp.sum(h_d * h_d)
    w_tv = jnp.sum(w_d * w_d)
    count_h = float(C * (H - 1) * W)
    count_w = float(C * H * (W - 1))
    losses_ref[2] = 2.0 * (h_tv / count_h + w_tv / count_w) / float(B)

    # ---------------- mass-equation physics residual ------------------------
    rho = hr[:, 0, :] * 20.0
    u = (hr[:, 1, :] + 200.0) * 1500.0
    v = (hr[:, 2, :] + 500.0) * 1500.0
    drho_dt = drho_ref[...] * 20.0

    dx = X_LEN / float(H)   # reference quirk: X_len / rho.shape[2]  (= H)
    dy = Y_LEN / 1.0        # reference quirk: Y_len / rho.shape[1]  (= 1)
    inv_dx = 1.0 / dx
    inv_dy = 1.0 / dy

    ru = rho * u
    rv = rho * v

    # d(rho*u)/dx along W: np.gradient style (central interior, one-sided edges).
    ru_p = pltpu.roll(ru, shift=HW - 1, axis=1)     # ru[i+1]   (wrap overridden)
    ru_m = pltpu.roll(ru, shift=1, axis=1)          # ru[i-1]   (wrap overridden)
    dru_dx = (ru_p - ru_m) * (0.5 * inv_dx)
    dru_dx = jnp.where(is_first_col, (ru_p - ru) * inv_dx, dru_dx)
    dru_dx = jnp.where(is_last_col, (ru - ru_m) * inv_dx, dru_dx)

    # d(rho*v)/dy along H.
    rv_p = pltpu.roll(rv, shift=HW - W, axis=1)     # rv[row+1] (wrap overridden)
    rv_m = pltpu.roll(rv, shift=W, axis=1)          # rv[row-1] (wrap overridden)
    drv_dy = (rv_p - rv_m) * (0.5 * inv_dy)
    drv_dy = jnp.where(is_first_row, (rv_p - rv) * inv_dy, drv_dy)
    drv_dy = jnp.where(is_last_row, (rv - rv_m) * inv_dy, drv_dy)

    residual_t = dru_dx + drv_dy
    residual = drho_dt - residual_t

    res_t_ref[...] = residual_t     # lane-dense (H*W multiple of 128) stores
    res_ref[...] = residual

    # mean((r / max|r|)^2) == sum(r^2) / (max|r|^2 * N): no full-field divide.
    # NOTE: keeps the reference's 0/0 -> NaN behaviour when residual == 0.
    max_abs = jnp.max(jnp.abs(residual))
    losses_ref[1] = jnp.sum(residual * residual) / (max_abs * max_abs * float(B * HW))


def generator_loss_pi_frvsr(out_labels, hr_est, hr_img, dvar_dt, idx=0):
    """Returns (image_loss, adversarial_loss, physics_loss_norm, tv_loss,
    residual_t, total_residual) -- same order/semantics as the PyTorch module."""
    del idx  # unused by the reference forward as well
    B, C, H, W = hr_est.shape
    HW = H * W

    # Lane-dense flattened views (minor dim = H*W).  Plain reshapes / a channel
    # slice at the XLA level; no extra passes over the data.
    hr_f = hr_est.reshape(B, C, HW).astype(jnp.float32)
    img_f = hr_img.reshape(B, C, HW).astype(jnp.float32)
    drho_f = dvar_dt[:, 0, :, :].reshape(B, HW).astype(jnp.float32)  # only ch. 0 used

    # Column-index table (flat_idx % W) built host-side; 4*H*W bytes, negligible.
    col_ids = jnp.asarray(np.arange(HW, dtype=np.int32) % W).reshape(1, HW)

    vmem = pl.BlockSpec(memory_space=pltpu.MemorySpace.VMEM)
    smem = pl.BlockSpec(memory_space=pltpu.MemorySpace.SMEM)

    losses, res_t, res = pl.pallas_call(
        functools.partial(_gen_loss_kernel, H=H, W=W),
        out_shape=(
            jax.ShapeDtypeStruct((3,), jnp.float32),     # [image, physics, tv]
            jax.ShapeDtypeStruct((B, HW), jnp.float32),  # residual_t
            jax.ShapeDtypeStruct((B, HW), jnp.float32),  # residual
        ),
        in_specs=[vmem, vmem, vmem, vmem],
        out_specs=(smem, vmem, vmem),
    )(col_ids, hr_f, img_f, drho_f)

    # adversarial_loss = BCE(out_labels, ones) = mean(-clamp(log(x), -100)).
    # A (B, 1) tensor would cost a whole VMEM tile + an input DMA just to reduce
    # two scalars, so it is computed as a fused XLA op outside the kernel.
    adversarial_loss = -jnp.mean(jnp.maximum(jnp.log(out_labels), -100.0))

    return (losses[0], adversarial_loss, losses[1], losses[2],
            res_t.reshape(B, 1, H, W), res.reshape(B, 1, H, W))


# ----------------------------- validation ------------------------------------

def _reference(out_labels, hr_est, hr_img, dvar_dt):
    """Pure-JAX reference mirroring the PyTorch forward (for validation)."""
    B, C, H, W = hr_est.shape
    adv = -jnp.mean(jnp.maximum(jnp.log(out_labels), -100.0))
    img = jnp.mean((hr_est - hr_img) ** 2)
    h_tv = jnp.sum((hr_est[:, :, 1:, :] - hr_est[:, :, :-1, :]) ** 2)
    w_tv = jnp.sum((hr_est[:, :, :, 1:] - hr_est[:, :, :, :-1]) ** 2)
    tv = 2.0 * (h_tv / (C * (H - 1) * W) + w_tv / (C * H * (W - 1))) / B
    rho = hr_est[:, 0:1] * 20.0
    u = (hr_est[:, 1:2] + 200.0) * 1500.0
    v = (hr_est[:, 2:3] + 500.0) * 1500.0
    drho_dt = dvar_dt[:, 0:1] * 20.0
    dx = X_LEN / H
    dy = Y_LEN / 1.0

    def gw(f):
        first = (f[..., 1:2] - f[..., 0:1]) / dx
        interior = (f[..., 2:] - f[..., :-2]) / (2.0 * dx)
        last = (f[..., -1:] - f[..., -2:-1]) / dx
        return jnp.concatenate([first, interior, last], axis=-1)

    def gh(f):
        first = (f[..., 1:2, :] - f[..., 0:1, :]) / dy
        interior = (f[..., 2:, :] - f[..., :-2, :]) / (2.0 * dy)
        last = (f[..., -1:, :] - f[..., -2:-1, :]) / dy
        return jnp.concatenate([first, interior, last], axis=-2)

    residual_t = gw(rho * u) + gh(rho * v)
    residual = drho_dt - residual_t
    rnorm = residual / jnp.max(jnp.abs(residual))
    phys = jnp.mean(rnorm * rnorm)
    return img, adv, phys, tv, residual_t, residual


def _rel_err(a, b):
    a = jnp.asarray(a, jnp.float32)
    b = jnp.asarray(b, jnp.float32)
    scale = jnp.maximum(jnp.max(jnp.abs(b)), 1e-30)
    return float(jnp.max(jnp.abs(a - b)) / scale)


if __name__ == "__main__":
    key = jax.random.PRNGKey(0)
    k1, k2, k3, k4 = jax.random.split(key, 4)

    # mass_eq indexes channels 0..4, so hr_est needs >= 5 channels.
    B, C, H, W = 2, 5, 16, 16
    out_labels = jax.nn.sigmoid(jax.random.normal(k1, (B, 1), jnp.float32))  # BCE input in (0,1)
    hr_est = jax.random.normal(k2, (B, C, H, W), jnp.float32)
    hr_img = jax.random.normal(k3, (B, C, H, W), jnp.float32)
    dvar_dt = jax.random.normal(k4, (B, C, H, W), jnp.float32)

    outs = jax.block_until_ready(
        generator_loss_pi_frvsr(out_labels, hr_est, hr_img, dvar_dt, idx=0))
    refs = jax.block_until_ready(_reference(out_labels, hr_est, hr_img, dvar_dt))

    assert outs[4].shape == (B, 1, H, W) and outs[5].shape == (B, 1, H, W)
    names = ("image_loss", "adversarial_loss", "physics_loss_norm", "tv_loss",
             "residual_t", "total_residual")
    for name, got, want in zip(names, outs, refs):
        err = _rel_err(got, want)
        assert err < 2e-3, f"{name}: rel err {err}"
    print("KERNEL_OK")
</pallas_src>

<mosaic_0001>
module attributes {stable_mosaic.version = 11 : i64} {
  func.func @_gen_loss_kernel(%arg0: memref<1x256xi32, #tpu.memory_space<vmem>>, %arg1: memref<2x5x256xf32, #tpu.memory_space<vmem>>, %arg2: memref<2x5x256xf32, #tpu.memory_space<vmem>>, %arg3: memref<2x256xf32, #tpu.memory_space<vmem>>, %arg4: memref<3xf32, #tpu.memory_space<smem>>, %arg5: memref<2x256xf32, #tpu.memory_space<vmem>>, %arg6: memref<2x256xf32, #tpu.memory_space<vmem>>) attributes {dimension_semantics = [], scalar_prefetch = 0 : i64, scratch_operands = 0 : i64, tpu.core_type = #tpu.core_type<tc>} {
    %c0 = arith.constant 0 : index
    %c0_0 = arith.constant 0 : index
    %c0_1 = arith.constant 0 : index
    %0 = vector.load %arg1[%c0, %c0_0, %c0_1] : memref<2x5x256xf32, #tpu.memory_space<vmem>>, vector<2x5x256xf32>
    %c0_2 = arith.constant 0 : index
    %c0_3 = arith.constant 0 : index
    %c0_4 = arith.constant 0 : index
    %1 = vector.load %arg2[%c0_2, %c0_3, %c0_4] : memref<2x5x256xf32, #tpu.memory_space<vmem>>, vector<2x5x256xf32>
    %c0_5 = arith.constant 0 : index
    %c0_6 = arith.constant 0 : index
    %2 = vector.load %arg0[%c0_5, %c0_6] : memref<1x256xi32, #tpu.memory_space<vmem>>, vector<1x256xi32>
    %3 = tpu.iota {dimensions = array<i32: 1>} : vector<1x256xi32>
    %c0_i32 = arith.constant 0 : i32
    %4 = vector.broadcast %c0_i32 : i32 to vector<1x256xi32>
    %5 = arith.cmpi eq, %2, %4 : vector<1x256xi32>
    %c15_i32 = arith.constant 15 : i32
    %6 = vector.broadcast %c15_i32 : i32 to vector<1x256xi32>
    %7 = arith.cmpi eq, %2, %6 : vector<1x256xi32>
    %c16_i32 = arith.constant 16 : i32
    %8 = vector.broadcast %c16_i32 : i32 to vector<1x256xi32>
    %9 = arith.cmpi slt, %3, %8 : vector<1x256xi32>
    %c240_i32 = arith.constant 240 : i32
    %10 = vector.broadcast %c240_i32 : i32 to vector<1x256xi32>
    %11 = arith.cmpi sge, %3, %10 : vector<1x256xi32>
    %12 = arith.subf %0, %1 : vector<2x5x256xf32>
    %13 = arith.mulf %12, %12 : vector<2x5x256xf32>
    %14 = vector.shape_cast %13 : vector<2x5x256xf32> to vector<1x2x5x256xf32>
    %cst = arith.constant dense<0.000000e+00> : vector<1xf32>
    %15 = vector.multi_reduction <add>, %14, %cst [1, 2, 3] : vector<1x2x5x256xf32> to vector<1xf32>
    %16 = vector.shape_cast %15 : vector<1xf32> to vector<1x1x1x1xf32>
    %17 = vector.extract %16[0, 0, 0, 0] : f32 from vector<1x1x1x1xf32>
    %cst_7 = arith.constant 2.560000e+03 : f32
    %18 = arith.divf %17, %cst_7 : f32
    %c0_8 = arith.constant 0 : index
    %19 = memref.load %arg4[%c0_8] : memref<3xf32, #tpu.memory_space<smem>>
    memref.store %18, %arg4[%c0_8] : memref<3xf32, #tpu.memory_space<smem>>
    %c255_i32 = arith.constant 255 : i32
    %20 = tpu.dynamic_rotate %0 by %c255_i32 dim 2 : vector<2x5x256xf32>, i32 -> vector<2x5x256xf32>
    %c240_i32_9 = arith.constant 240 : i32
    %21 = tpu.dynamic_rotate %0 by %c240_i32_9 dim 2 : vector<2x5x256xf32>, i32 -> vector<2x5x256xf32>
    %22 = vector.shape_cast %7 : vector<1x256xi1> to vector<1x1x256xi1>
    %23 = arith.subf %20, %0 : vector<2x5x256xf32>
    %cst_10 = arith.constant 0.000000e+00 : f32
    %24 = vector.shape_cast %22 : vector<1x1x256xi1> to vector<1x1x256xi1>
    %25 = vector.broadcast %24 : vector<1x1x256xi1> to vector<2x5x256xi1>
    %26 = vector.broadcast %cst_10 : f32 to vector<2x5x256xf32>
    %27 = arith.select %25, %26, %23 : vector<2x5x256xi1>, vector<2x5x256xf32>
    %28 = vector.shape_cast %11 : vector<1x256xi1> to vector<1x1x256xi1>
    %29 = arith.subf %21, %0 : vector<2x5x256xf32>
    %cst_11 = arith.constant 0.000000e+00 : f32
    %30 = vector.shape_cast %28 : vector<1x1x256xi1> to vector<1x1x256xi1>
    %31 = vector.broadcast %30 : vector<1x1x256xi1> to vector<2x5x256xi1>
    %32 = vector.broadcast %cst_11 : f32 to vector<2x5x256xf32>
    %33 = arith.select %31, %32, %29 : vector<2x5x256xi1>, vector<2x5x256xf32>
    %34 = arith.mulf %33, %33 : vector<2x5x256xf32>
    %35 = vector.shape_cast %34 : vector<2x5x256xf32> to vector<1x2x5x256xf32>
    %cst_12 = arith.constant dense<0.000000e+00> : vector<1xf32>
    %36 = vector.multi_reduction <add>, %35, %cst_12 [1, 2, 3] : vector<1x2x5x256xf32> to vector<1xf32>
    %37 = vector.shape_cast %36 : vector<1xf32> to vector<1x1x1x1xf32>
    %38 = vector.extract %37[0, 0, 0, 0] : f32 from vector<1x1x1x1xf32>
    %39 = arith.mulf %27, %27 : vector<2x5x256xf32>
    %40 = vector.shape_cast %39 : vector<2x5x256xf32> to vector<1x2x5x256xf32>
    %cst_13 = arith.constant dense<0.000000e+00> : vector<1xf32>
    %41 = vector.multi_reduction <add>, %40, %cst_13 [1, 2, 3] : vector<1x2x5x256xf32> to vector<1xf32>
    %42 = vector.shape_cast %41 : vector<1xf32> to vector<1x1x1x1xf32>
    %43 = vector.extract %42[0, 0, 0, 0] : f32 from vector<1x1x1x1xf32>
    %cst_14 = arith.constant 1.200000e+03 : f32
    %44 = arith.divf %38, %cst_14 : f32
    %cst_15 = arith.constant 1.200000e+03 : f32
    %45 = arith.divf %43, %cst_15 : f32
    %46 = arith.addf %44, %45 : f32
    %cst_16 = arith.constant 2.000000e+00 : f32
    %47 = arith.mulf %cst_16, %46 : f32
    %cst_17 = arith.constant 2.000000e+00 : f32
    %48 = arith.divf %47, %cst_17 : f32
    %c2 = arith.constant 2 : index
    %49 = memref.load %arg4[%c2] : memref<3xf32, #tpu.memory_space<smem>>
    memref.store %48, %arg4[%c2] : memref<3xf32, #tpu.memory_space<smem>>
    %50 = vector.extract_strided_slice %0 {offsets = [0, 0, 0], sizes = [2, 1, 256], strides = [1, 1, 1]} : vector<2x5x256xf32> to vector<2x1x256xf32>
    %51 = vector.shape_cast %50 : vector<2x1x256xf32> to vector<2x256xf32>
    %cst_18 = arith.constant 2.000000e+01 : f32
    %52 = vector.broadcast %cst_18 : f32 to vector<2x256xf32>
    %53 = arith.mulf %51, %52 : vector<2x256xf32>
    %54 = vector.extract_strided_slice %0 {offsets = [0, 1, 0], sizes = [2, 1, 256], strides = [1, 1, 1]} : vector<2x5x256xf32> to vector<2x1x256xf32>
    %55 = vector.shape_cast %54 : vector<2x1x256xf32> to vector<2x256xf32>
    %cst_19 = arith.constant 2.000000e+02 : f32
    %56 = vector.broadcast %cst_19 : f32 to vector<2x256xf32>
    %57 = arith.addf %55, %56 : vector<2x256xf32>
    %cst_20 = arith.constant 1.500000e+03 : f32
    %58 = vector.broadcast %cst_20 : f32 to vector<2x256xf32>
    %59 = arith.mulf %57, %58 : vector<2x256xf32>
    %60 = vector.extract_strided_slice %0 {offsets = [0, 2, 0], sizes = [2, 1, 256], strides = [1, 1, 1]} : vector<2x5x256xf32> to vector<2x1x256xf32>
    %61 = vector.shape_cast %60 : vector<2x1x256xf32> to vector<2x256xf32>
    %cst_21 = arith.constant 5.000000e+02 : f32
    %62 = vector.broadcast %cst_21 : f32 to vector<2x256xf32>
    %63 = arith.addf %61, %62 : vector<2x256xf32>
    %cst_22 = arith.constant 1.500000e+03 : f32
    %64 = vector.broadcast %cst_22 : f32 to vector<2x256xf32>
    %65 = arith.mulf %63, %64 : vector<2x256xf32>
    %c0_23 = arith.constant 0 : index
    %c0_24 = arith.constant 0 : index
    %66 = vector.load %arg3[%c0_23, %c0_24] : memref<2x256xf32, #tpu.memory_space<vmem>>, vector<2x256xf32>
    %cst_25 = arith.constant 2.000000e+01 : f32
    %67 = vector.broadcast %cst_25 : f32 to vector<2x256xf32>
    %68 = arith.mulf %66, %67 : vector<2x256xf32>
    %69 = arith.mulf %53, %59 : vector<2x256xf32>
    %70 = arith.mulf %53, %65 : vector<2x256xf32>
    %c255_i32_26 = arith.constant 255 : i32
    %71 = tpu.dynamic_rotate %69 by %c255_i32_26 dim 1 : vector<2x256xf32>, i32 -> vector<2x256xf32>
    %c1_i32 = arith.constant 1 : i32
    %72 = tpu.dynamic_rotate %69 by %c1_i32 dim 1 : vector<2x256xf32>, i32 -> vector<2x256xf32>
    %73 = arith.subf %71, %72 : vector<2x256xf32>
    %cst_27 = arith.constant 4.000000e+01 : f32
    %74 = vector.broadcast %cst_27 : f32 to vector<2x256xf32>
    %75 = arith.mulf %73, %74 : vector<2x256xf32>
    %76 = arith.subf %71, %69 : vector<2x256xf32>
    %cst_28 = arith.constant 8.000000e+01 : f32
    %77 = vector.broadcast %cst_28 : f32 to vector<2x256xf32>
    %78 = arith.mulf %76, %77 : vector<2x256xf32>
    %79 = vector.shape_cast %5 : vector<1x256xi1> to vector<1x256xi1>
    %80 = vector.broadcast %79 : vector<1x256xi1> to vector<2x256xi1>
    %81 = arith.select %80, %78, %75 : vector<2x256xi1>, vector<2x256xf32>
    %82 = arith.subf %69, %72 : vector<2x256xf32>
    %cst_29 = arith.constant 8.000000e+01 : f32
    %83 = vector.broadcast %cst_29 : f32 to vector<2x256xf32>
    %84 = arith.mulf %82, %83 : vector<2x256xf32>
    %85 = vector.shape_cast %7 : vector<1x256xi1> to vector<1x256xi1>
    %86 = vector.broadcast %85 : vector<1x256xi1> to vector<2x256xi1>
    %87 = arith.select %86, %84, %81 : vector<2x256xi1>, vector<2x256xf32>
    %c240_i32_30 = arith.constant 240 : i32
    %88 = tpu.dynamic_rotate %70 by %c240_i32_30 dim 1 : vector<2x256xf32>, i32 -> vector<2x256xf32>
    %c16_i32_31 = arith.constant 16 : i32
    %89 = tpu.dynamic_rotate %70 by %c16_i32_31 dim 1 : vector<2x256xf32>, i32 -> vector<2x256xf32>
    %90 = arith.subf %88, %89 : vector<2x256xf32>
    %cst_32 = arith.constant 1.250000e+00 : f32
    %91 = vector.broadcast %cst_32 : f32 to vector<2x256xf32>
    %92 = arith.mulf %90, %91 : vector<2x256xf32>
    %93 = arith.subf %88, %70 : vector<2x256xf32>
    %cst_33 = arith.constant 2.500000e+00 : f32
    %94 = vector.broadcast %cst_33 : f32 to vector<2x256xf32>
    %95 = arith.mulf %93, %94 : vector<2x256xf32>
    %96 = vector.shape_cast %9 : vector<1x256xi1> to vector<1x256xi1>
    %97 = vector.broadcast %96 : vector<1x256xi1> to vector<2x256xi1>
    %98 = arith.select %97, %95, %92 : vector<2x256xi1>, vector<2x256xf32>
    %99 = arith.subf %70, %89 : vector<2x256xf32>
    %cst_34 = arith.constant 2.500000e+00 : f32
    %100 = vector.broadcast %cst_34 : f32 to vector<2x256xf32>
    %101 = arith.mulf %99, %100 : vector<2x256xf32>
    %102 = vector.shape_cast %11 : vector<1x256xi1> to vector<1x256xi1>
    %103 = vector.broadcast %102 : vector<1x256xi1> to vector<2x256xi1>
    %104 = arith.select %103, %101, %98 : vector<2x256xi1>, vector<2x256xf32>
    %105 = arith.addf %87, %104 : vector<2x256xf32>
    %106 = arith.subf %68, %105 : vector<2x256xf32>
    %c0_35 = arith.constant 0 : index
    %c0_36 = arith.constant 0 : index
    %107 = vector.load %arg5[%c0_35, %c0_36] : memref<2x256xf32, #tpu.memory_space<vmem>>, vector<2x256xf32>
    tpu.vector_store %arg5[%c0_35, %c0_36], %105 {strides = array<i32>} : memref<2x256xf32, #tpu.memory_space<vmem>>, vector<2x256xf32>,
    %c0_37 = arith.constant 0 : index
    %c0_38 = arith.constant 0 : index
    %108 = vector.load %arg6[%c0_37, %c0_38] : memref<2x256xf32, #tpu.memory_space<vmem>>, vector<2x256xf32>
    tpu.vector_store %arg6[%c0_37, %c0_38], %106 {strides = array<i32>} : memref<2x256xf32, #tpu.memory_space<vmem>>, vector<2x256xf32>,
    %109 = math.absf %106 : vector<2x256xf32>
    %110 = vector.shape_cast %109 : vector<2x256xf32> to vector<1x2x256xf32>
    %cst_39 = arith.constant dense<0xFF800000> : vector<1xf32>
    %111 = vector.multi_reduction <maximumf>, %110, %cst_39 [1, 2] : vector<1x2x256xf32> to vector<1xf32>
    %112 = vector.shape_cast %111 : vector<1xf32> to vector<1x1x1xf32>
    %113 = vector.extract %112[0, 0, 0] : f32 from vector<1x1x1xf32>
    %114 = arith.mulf %106, %106 : vector<2x256xf32>
    %115 = vector.shape_cast %114 : vector<2x256xf32> to vector<1x2x256xf32>
    %cst_40 = arith.constant dense<0.000000e+00> : vector<1xf32>
    %116 = vector.multi_reduction <add>, %115, %cst_40 [1, 2] : vector<1x2x256xf32> to vector<1xf32>
    %117 = vector.shape_cast %116 : vector<1xf32> to vector<1x1x1xf32>
    %118 = vector.extract %117[0, 0, 0] : f32 from vector<1x1x1xf32>
    %119 = arith.mulf %113, %113 : f32
    %cst_41 = arith.constant 5.120000e+02 : f32
    %120 = arith.mulf %119, %cst_41 : f32
    %121 = arith.divf %118, %120 : f32
    %c1 = arith.constant 1 : index
    %122 = memref.load %arg4[%c1] : memref<3xf32, #tpu.memory_space<smem>>
    memref.store %121, %arg4[%c1] : memref<3xf32, #tpu.memory_space<smem>>
    return
  }
}

</mosaic_0001>

<bundles_post_ra>
// kernel: tpu_custom_call.1
= control target key start
LH: loop header
LB: loop body
LE: loop exit
PB: predicated region body
PF: predicated region fallthrough
CT: control target
= control target key end

     0   :  { %12 = vsyncpa [#allocation4], 0  ;;  %s859_s0 = inlined_call_operand.vmem [shape: s32[1,256], index: 0, kind: input, shape index: {}]   ;;  %s860_s1 = inlined_call_operand.vmem [shape: f32[2,5,256], index: 1, kind: input, shape index: {}]   ;;  %s861_s2 = inlined_call_operand.vmem [shape: f32[2,5,256], index: 2, kind: input, shape index: {}]   ;;  %s862_s3 = inlined_call_operand.vmem [shape: f32[2,256], index: 3, kind: input, shape index: {}]   ;;  %s863_s4 = inlined_call_operand.hbm [shape: f32[3], index: 4, kind: output, shape index: {0}]   ;;  %s864_s5 = inlined_call_operand.hbm [shape: f32[2,256], index: 5, kind: output, shape index: {1}]   ;;  %s865_s6 = inlined_call_operand.hbm [shape: f32[2,256], index: 6, kind: output, shape index: {2}]  }
   0x1   :  { %13 = vsyncpa [#allocation3], 0  ;;  %v617_v0 = vld [vmem:[%s860_s1] sm:$0x1f]  ;;  %v622_v1 = vld [vmem:[%s860_s1 + $0x10] sm:$0x1f] }
   0x2   :  { %vm240_vm0 = vcmask 1041409   ;;  %v181_v2 = vmul.f32 20.0, %v617_v0  ;;  %v183_v3 = vmul.f32 20.0, %v622_v1  ;;  %v193_v4 = vadd.f32 500.0, %v617_v0  ;;  %v633_v8 = vld [vmem:[%s860_s1 + $0x8] sm:$0x1f] }
   0x3   :  { %v195_v5 = vadd.f32 500.0, %v622_v1  ;;  %v185_v6 = vadd.f32 200.0, %v617_v0  ;;  %v187_v7 = vadd.f32 200.0, %v622_v1  ;;  %v638_v9 = vld [vmem:[%s860_s1 + $0x18] sm:$0x1f]  ;;  %v182_v12 = vmul.f32 20.0, %v633_v8 }
   0x4   :  { %v197_v10 = vmul.f32 1500.0, %v193_v4  ;;  %v184_v13 = vmul.f32 20.0, %v638_v9  ;;  %v194_v16 = vadd.f32 500.0, %v633_v8  ;;  %v196_v17 = vadd.f32 500.0, %v638_v9 }
   0x5   :  { %v199_v11 = vmul.f32 1500.0, %v195_v5  ;;  %v189_v14 = vmul.f32 1500.0, %v185_v6  ;;  %v191_v15 = vmul.f32 1500.0, %v187_v7 }
   0x6   :  { %14 = vsyncpa [#allocation7], 0  ;;  %v223_v18 = vrot.slane %v197_v10, 2  ;;  %v186_v20 = vadd.f32 200.0, %v633_v8  ;;  %v188_v21 = vadd.f32 200.0, %v638_v9  ;;  %v198_v24 = vmul.f32 1500.0, %v194_v16 }
   0x7   :  { %v225_v19 = vrot.slane %v199_v11, 2  ;;  %v207_v22 = vrot.slane %v189_v14, 1  ;;  %v209_v23 = vrot.slane %v191_v15, 1  ;;  %v200_v25 = vmul.f32 1500.0, %v196_v17  ;;  %s570_s1 = smov 16   ;;  %s571_s29 = smov 1  }
   0x8   :  { %v231_v26 = vmul.f32 %v223_v18, %v181_v2  ;;  %v190_v28 = vmul.f32 1500.0, %v186_v20  ;;  %v192_v29 = vmul.f32 1500.0, %v188_v21  ;;  %v224_v32 = vrot.slane %v198_v24, 2  ;;  %s572_s30 = smov 127   ;;  %s573_s7 = smov 112  }
   0x9   :  { %v233_v27 = vmul.f32 %v225_v19, %v183_v3  ;;  %v646_v30 = vmul.f32 %v207_v22, %v181_v2  ;;  %v648_v31 = vmul.f32 %v209_v23, %v183_v3  ;;  %v226_v33 = vrot.slane %v200_v25, 2  ;;  %v27_v48 = vld [vmem:[%s861_s2] sm:$0x1f]  ;;  %v28_v49 = vld [vmem:[%s861_s2 + $0x8] sm:$0x1f]  ;;  %s576_s19 = smov [#allocation5]  }
   0xa   :  { %v208_v35 = vrot.slane %v190_v28, 1  ;;  %v210_v36 = vrot.slane %v192_v29, 1  ;;  %v651_v38 = vmul.f32 %v224_v32, %v182_v12  ;;  %v41_v50 = vsub.f32 %v617_v0, %v27_v48  ;;  %v29_v52 = vld [vmem:[%s861_s2 + $0x10] sm:$0x1f]  ;;  %v30_v56 = vld [vmem:[%s861_s2 + $0x18] sm:$0x1f] }
   0xb   :  { %v312_v34 = vrot.slane %v233_v27, 7  ;;  %v239_v37 = vrot.slane %v648_v31, 7  ;;  %v653_v39 = vmul.f32 %v226_v33, %v184_v13  ;;  %v42_v51 = vsub.f32 %v633_v8, %v28_v49  ;;  %v31_v6 = vld [vmem:[%s859_s0] sm:$0x3]  ;;  %s459_s20 = sshll.u32 %s576_s19, 4  ;;  %s577_s21 = smov [#allocation6]   ;;  %s460_s20 = int_to_ptr.vmem [resolvable:$true] %s459_s20 }
   0xc   :  { %v658_v41 = vmul.f32 %v208_v35, %v182_v12  ;;  %v660_v42 = vmul.f32 %v210_v36, %v184_v13  ;;  %v43_v53 = vsub.f32 %v622_v1, %v29_v52  ;;  %v45_v54 = vmul.f32 %v41_v50, %v41_v50  ;;  %s469_s22 = sshll.u32 %s577_s21, 4  ;;  %s510_s23 = scalar_lea.vmem %s460_s20, 64  ;;  %s816_s22 = int_to_ptr.vmem [resolvable:$true] %s469_s22 }
   0xd   :  { %v656_v40 = vsel %vm240_vm0, %v312_v34, %v231_v26  ;;  %v665_v43 = vsel %vm240_vm0, %v239_v37, %v646_v30  ;;  %v314_v44 = vrot.slane %v653_v39, 7  ;;  %v46_v55 = vmul.f32 %v42_v51, %v42_v51  ;;  %p511_p0 = scmp.ne.s32.totalorder %s460_s20, %s510_s23  ;;  %p515_p1 = scmp.lt.s32.totalorder %s460_s20, %s460_s20 }
   0xe   :  { %324 = vrot.lane.b32.xlu1 %v656_v40, %s570_s1  ;;  %252 = vrot.lane.b32.xlu0 %v665_v43, %s571_s29  ;;  %v242_v45 = vrot.slane %v660_v42, 7  ;;  %vm49_vm1 = vcmask 1044480   ;;  %v44_v57 = vsub.f32 %v638_v9, %v30_v56  ;;  %v47_v58 = vmul.f32 %v43_v53, %v43_v53  ;;  %p516_p2 = scmp.lt.s32.totalorder %s510_s23, %s510_s23 }
   0xf   :  { %v315_v46 = vsel %vm240_vm0, %v314_v44, %v651_v38  ;;  %v50_v59 = vsel %vm49_vm1, %v45_v54, 0.0  ;;  %v51_v60 = vsel %vm49_vm1, %v46_v55, 0.0  ;;  %v32_v5 = vlaneseq }
  0x10   :  { %v674_v47 = vsel %vm240_vm0, %v242_v45, %v658_v41  ;;  %v52_v61 = vadd.f32 %v51_v60, %v50_v59  ;;  %v48_v62 = vmul.f32 %v44_v57, %v44_v57  ;;  %v53_v63 = vsel %vm49_vm1, %v47_v58, 0.0  ;;  %p517_p3 = por %p516_p2, %p515_p1 }
  0x11   :  { %v711_v7 = vshrl.u32 %v32_v5, 7  ;;  %v713_v10 = vand.u32 127, %v32_v5  ;;  %vm35_vm2 = vcmp.eq.s32.totalorder %v31_v6, 0  ;;  %vm36_vm3 = vcmp.eq.s32.totalorder %v31_v6, 15 }
  0x12   :  { %326 = vrot.lane.b32.xlu1 %v315_v46, %s570_s1  ;;  %254 = vrot.lane.b32.xlu0 %v674_v47, %s571_s29  ;;  %v54_v2 = vadd.f32 %v53_v63, %v52_v61  ;;  %v55_v3 = vsel %vm49_vm1, %v48_v62, 0.0  ;;  %v574_v15 = vmov 0   ;;  %v575_v26 = vmov 1983009808   ;;  %p518_p4 = pnand %p517_p3, %p511_p0 }
  0x13   :  { %v104_v12 = vsub.s32 0, %v711_v7  ;;  %v108_v13 = vsub.s32 1, %v711_v7  ;;  %v267_v16 = vsel %vm35_vm2, 1, %v574_v15  ;;  %vm37_vm4 = vcmp.lt.s32.totalorder %v713_v10, 16 }
  0x14   :  { %v56_v4 = vadd.f32 %v55_v3, %v54_v2  ;;  %v101_v17 = vsel %vm36_vm3, 1, %v574_v15  ;;  %vm256_vm5 = vcmp.lt.s32.totalorder %v713_v10, 1  ;;  %v720_v21 = vadd.s32 128, %v713_v10 }
  0x15   :  { %v271_v19 = vrot.slane %v267_v16, %v104_v12  ;;  %v275_v20 = vrot.slane %v267_v16, %v108_v13  ;;  %v724_v24 = vrot.slane %v101_v17, %v104_v12  ;;  %v726_v25 = vrot.slane %v101_v17, %v108_v13 }
  0x16   :  { %248 = vrot.lane.b32.xlu1 %v674_v47, %s572_s30  ;;  %246 = vrot.lane.b32.xlu0 %v665_v43, %s572_s30  ;;  %v728_v27 = vunpack.c.l.s4 %v575_v26  ;;  %vm79_vm6 = vcmp.lt.s32.totalorder %v713_v10, 127  ;;  %vm92_vm9 = vcmp.lt.s32.totalorder %v713_v10, 112  ;;  %vm40_vm12 = vcmp.ge.s32.totalorder %v720_v21, 240 }
  0x17   :  { %vm276_vm7 = vcmp.eq.s32.totalorder %v271_v19, 1  ;;  %vm277_vm8 = vcmp.eq.s32.totalorder %v275_v20, 1  ;;  %vm110_vm10 = vcmp.eq.s32.totalorder %v724_v24, 1  ;;  %vm111_vm11 = vcmp.eq.s32.totalorder %v726_v25, 1 }
  0x18   :  { %vm400_vm13 = vcmask 1041408  }
  0x1a   :  { %320 = vrot.lane.b32.xlu1 %v315_v46, %s573_s7  ;;  %318 = vrot.lane.b32.xlu0 %v656_v40, %s573_s7 }
  0x1e   :  { %75 = vrot.lane.b32.xlu1 %v633_v8, %s572_s30  ;;  %71 = vrot.lane.b32.xlu0 %v617_v0, %s572_s30 }
  0x22   :  { %88 = vrot.lane.b32.xlu1 %v633_v8, %s573_s7  ;;  %84 = vrot.lane.b32.xlu0 %v617_v0, %s573_s7 }
  0x26   :  { %77 = vrot.lane.b32.xlu1 %v638_v9, %s572_s30  ;;  %73 = vrot.lane.b32.xlu0 %v622_v1, %s572_s30 }
  0x2a   :  { %90 = vrot.lane.b32.xlu1 %v638_v9, %s573_s7  ;;  %86 = vrot.lane.b32.xlu0 %v622_v1, %s573_s7 }
  0x49   :  { %57 = vadd.xlane.f32.xlu0 %v56_v4 }
  0x80   :  { %v325_v11 = vpop.permute.xlu1 %324  ;;  %v253_v14 = vpop.permute.xlu0 %252 }
  0x84   :  { %v327_v18 = vpop.permute.xlu1 %326  ;;  %v255_v23 = vpop.permute.xlu0 %254 }
  0x85   :  { %v328_v22 = vsel %vm37_vm4, %v325_v11, %v327_v18  ;;  %v257_v29 = vsel %vm256_vm5, %v253_v14, %v255_v23  ;;  %v258_v32 = vsel %vm256_vm5, %v255_v23, %v253_v14  ;;  %v329_v53 = vsel %vm37_vm4, %v327_v18, %v325_v11 }
  0x86   :  { %v347_v28 = vrot.slane %v328_v22, 1  ;;  %v282_v33 = vrot.slane %v258_v32, 1  ;;  %v283_v34 = vrot.slane %v257_v29, 1  ;;  %v288_v37 = vsub.f32 %v646_v30, %v258_v32 }
  0x87   :  { %v289_v49 = vsub.f32 %v658_v41, %v257_v29  ;;  %v353_v54 = vsub.f32 %v651_v38, %v328_v22 }
  0x88   :  { %v355_v35 = vsub.f32 %v653_v39, %v347_v28  ;;  %v249_v36 = vpop.permute.xlu1 %248  ;;  %v290_v44 = vsub.f32 %v648_v31, %v282_v33  ;;  %v291_v45 = vsub.f32 %v660_v42, %v283_v34  ;;  %v247_v46 = vpop.permute.xlu0 %246  ;;  %v379_v39 = vunpack.c.0.s8 %v728_v27 }
  0x89   :  { %v250_v50 = vsel %vm79_vm6, %v247_v46, %v249_v36  ;;  %v251_v30 = vsel %vm79_vm6, %v249_v36, %v247_v46  ;;  %v292_v62 = vmul.f32 80.0, %v288_v37  ;;  %v293_v5 = vmul.f32 80.0, %v289_v49  ;;  %v201_v36 = vld [vmem:[%s862_s3] sm:$0xf] }
  0x8a   :  { %v359_v48 = vmul.f32 2.5, %v355_v35  ;;  %v294_v31 = vmul.f32 80.0, %v290_v44  ;;  %v295_v42 = vmul.f32 80.0, %v291_v45  ;;  %v259_v51 = vsub.f32 %v250_v50, %v258_v32 }
  0x8b   :  { %v260_v52 = vsub.f32 %v251_v30, %v257_v29  ;;  %v263_v55 = vsub.f32 %v250_v50, %v665_v43  ;;  %v264_v56 = vsub.f32 %v251_v30, %v674_v47  ;;  %v357_v6 = vmul.f32 2.5, %v353_v54 }
  0x8c   :  { %v321_v41 = vpop.permute.xlu1 %320  ;;  %v300_v57 = vrot.slane %v294_v31, 7  ;;  %v302_v58 = vrot.slane %v295_v42, 7  ;;  %v261_v59 = vmul.f32 40.0, %v259_v51  ;;  %v319_v61 = vpop.permute.xlu0 %318  ;;  %v366_v4 = vrot.slane %v359_v48, 7 }
  0x8d   :  { %v262_v60 = vmul.f32 40.0, %v260_v52  ;;  %v265_v63 = vmul.f32 80.0, %v263_v55  ;;  %v266_v2 = vmul.f32 80.0, %v264_v56  ;;  %v322_v3 = vsel %vm92_vm9, %v319_v61, %v321_v41 }
  0x8e   :  { %v323_v38 = vsel %vm92_vm9, %v321_v41, %v319_v61  ;;  %v330_v43 = vsub.f32 %v322_v3, %v329_v53  ;;  %v301_v47 = vsel %vm240_vm0, %v300_v57, %v292_v62  ;;  %v334_v12 = vsub.f32 %v322_v3, %v656_v40 }
  0x8f   :  { %v331_v11 = vsub.f32 %v323_v38, %v328_v22  ;;  %v303_v14 = vsel %vm240_vm0, %v302_v58, %v293_v5  ;;  %v278_v15 = vsel %vm276_vm7, %v265_v63, %v261_v59  ;;  %v279_v16 = vsel %vm277_vm8, %v266_v2, %v262_v60 }
  0x90   :  { %v76_v13 = vpop.permute.xlu1 %75  ;;  %v332_v17 = vmul.f32 1.25, %v330_v43  ;;  %v72_v18 = vpop.permute.xlu0 %71  ;;  %v336_v26 = vmul.f32 2.5, %v334_v12  ;;  %v367_v22 = vsel %vm240_vm0, %v366_v4, %v357_v6  ;;  %v382_v19 = vsub.s32 %v379_v39, %v711_v7 }
  0x91   :  { %v333_v23 = vmul.f32 1.25, %v331_v11  ;;  %v80_v27 = vsel %vm79_vm6, %v72_v18, %v76_v13  ;;  %v82_v28 = vsel %vm79_vm6, %v76_v13, %v72_v18  ;;  %v306_v32 = vsel %vm110_vm10, %v301_v47, %v278_v15 }
  0x92   :  { %v97_v40 = vsub.f32 %v80_v27, %v617_v0  ;;  %v98_v29 = vsub.f32 %v82_v28, %v633_v8  ;;  %v342_v20 = vsel %vm37_vm4, %v336_v26, %v332_v17  ;;  %v307_v33 = vsel %vm111_vm11, %v303_v14, %v279_v16 }
  0x93   :  { %v371_v35 = vsel %vm40_vm12, %v367_v22, %v333_v23  ;;  %v372_v37 = vadd.f32 %v342_v20, %v306_v32  ;;  %v202_v51 = vmul.f32 20.0, %v201_v36 }
  0x94   :  { %v89_v34 = vpop.permute.xlu1 %88  ;;  %v112_v7 = vsel %vm110_vm10, 0.0, %v97_v40  ;;  %v113_v44 = vsel %vm111_vm11, 0.0, %v98_v29  ;;  %v373_v45 = vadd.f32 %v371_v35, %v307_v33  ;;  %v85_v46 = vpop.permute.xlu0 %84 }
  0x95   :  { %v148_v39 = vmul.f32 %v112_v7, %v112_v7  ;;  %v149_v48 = vmul.f32 %v113_v44, %v113_v44  ;;  %v93_v49 = vsel %vm92_vm9, %v85_v46, %v89_v34  ;;  %v95_v50 = vsel %vm92_vm9, %v89_v34, %v85_v46 }
  0x96   :  { %v376_v30 = vcombine.low %v372_v37, %v373_v45  ;;  %v116_v31 = vsub.f32 %v93_v49, %v617_v0  ;;  %v117_v42 = vsub.f32 %v95_v50, %v633_v8 }
  0x97   :  { %v152_v53 = vsel %vm49_vm1, %v148_v39, 0.0  ;;  %v153_v41 = vsel %vm49_vm1, %v149_v48, 0.0 }
  0x98   :  { %v78_v52 = vpop.permute.xlu1 %77  ;;  %v125_v54 = vsel %vm40_vm12, 0.0, %v117_v42  ;;  %v128_v55 = vmul.f32 %v116_v31, %v116_v31  ;;  %486 = vst.sshfl [vmem:[#allocation5] sm:$0x33 pattern:$0x76325410] %v376_v30  ;;  %v74_v56 = vpop.permute.xlu0 %73  ;;  %v383_v57 = vrot.slane %v376_v30, %v382_v19  ;;  %v154_v2 = vadd.f32 %v153_v41, %v152_v53 }
  0x99   :  { %v129_v58 = vmul.f32 %v125_v54, %v125_v54  ;;  %v81_v59 = vsel %vm79_vm6, %v74_v56, %v78_v52  ;;  %v83_v0 = vsel %vm79_vm6, %v78_v52, %v74_v56 }
  0x9a   :  { %v99_v8 = vsub.f32 %v81_v59, %v622_v1  ;;  %v100_v60 = vsub.f32 %v83_v0, %v638_v9  ;;  %v385_v61 = vsub.f32 %v202_v51, %v383_v57  ;;  %v132_v62 = vsel %vm49_vm1, %v128_v55, 0.0 }
  0x9b   :  { %v133_v38 = vsel %vm49_vm1, %v129_v58, 0.0 }
  0x9c   :  { %v91_v63 = vpop.permute.xlu1 %90  ;;  %v114_v3 = vsel %vm110_vm10, 0.0, %v99_v8  ;;  %v87_v4 = vpop.permute.xlu0 %86  ;;  %v115_v5 = vsel %vm111_vm11, 0.0, %v100_v60  ;;  %v388_v43 = vand.u32 2147483647, %v385_v61  ;;  %387 = vst [vmem:[#allocation6] sm:$0xf] %v385_v61  ;;  %v413_v15 = vmul.f32 %v385_v61, %v385_v61 }
  0x9d   :  { %v150_v6 = vmul.f32 %v114_v3, %v114_v3  ;;  %v94_v47 = vsel %vm92_vm9, %v87_v4, %v91_v63  ;;  %v96_v11 = vsel %vm92_vm9, %v91_v63, %v87_v4  ;;  %v151_v12 = vmul.f32 %v115_v5, %v115_v5 }
  0x9e   :  { %v118_v13 = vsub.f32 %v94_v47, %v622_v1  ;;  %v119_v24 = vsub.f32 %v96_v11, %v638_v9  ;;  %v396_v14 = vrot.slane %v388_v43, %v382_v19  ;;  %v134_v10 = vadd.f32 %v133_v38, %v132_v62 }
  0x9f   :  { %v155_v25 = vsel %vm49_vm1, %v150_v6, 0.0  ;;  %v157_v26 = vsel %vm49_vm1, %v151_v12, 0.0  ;;  %v421_v28 = vrot.slane %v413_v15, %v382_v19 }
  0xa0   :  { %v130_v16 = vmul.f32 %v118_v13, %v118_v13  ;;  %v156_v17 = vadd.f32 %v155_v25, %v154_v2  ;;  %v127_v18 = vsel %vm40_vm12, 0.0, %v119_v24  ;;  %v397_v23 = vcombine.high %v396_v14, %v396_v14 }
  0xa1   :  { %v131_v27 = vmul.f32 %v127_v18, %v127_v18  ;;  %v422_v20 = vcombine.high %v421_v28, %v421_v28  ;;  %v401_v33 = vsel %vm400_vm13, %v396_v14, -inf  ;;  %v425_v35 = vsel %vm400_vm13, %v421_v28, 0.0 }
  0xa2   :  { %v158_v22 = vadd.f32 %v157_v26, %v156_v17  ;;  %v135_v1 = vsel %vm49_vm1, %v130_v16, 0.0  ;;  %v402_v29 = vsel %vm400_vm13, %v397_v23, -inf }
  0xa3   :  { %v136_v9 = vadd.f32 %v135_v1, %v134_v10  ;;  %v137_v40 = vsel %vm49_vm1, %v131_v27, 0.0  ;;  %v403_v21 = vmax.f32 %v401_v33, %v402_v29  ;;  %v426_v34 = vsel %vm400_vm13, %v422_v20, 0.0 }
  0xa4   :  { %159 = vadd.xlane.f32.xlu0 %v158_v22  ;;  %v427_v36 = vadd.f32 %v426_v34, %v425_v35 }
  0xa5   :  { %v138_v32 = vadd.f32 %v137_v40, %v136_v9 }
  0xa7   :  { %139 = vadd.xlane.f32.xlu1 %v138_v32 }
  0xa8   :  { %404 = vmax.xlane.f32.xlu0 %v403_v21 }
  0xab   :  { %428 = vadd.xlane.f32.xlu1 %v427_v36 }
  0xd6   :  { %v58_v19 = vpop.xlane.xlu0 %57 }
  0xd7   :  { %v59_v37 = vrot.slane %v58_v19, 4 }
  0xd9   :  { %v60_v7 = vadd.f32 %v59_v37, %v58_v19 }
  0xdb   :  { %v61_v44 = vrot.slane %v60_v7, 2 }
  0xdd   :  { %v62_v45 = vadd.f32 %v61_v44, %v60_v7 }
  0xdf   :  { %v63_v46 = vrot.slane %v62_v45, 1 }
  0xe1   :  { %v64_v39 = vadd.f32 %v63_v46, %v62_v45 }
  0xe3   :  { %487 = vpush %v64_v39 }
 0x114   :  { %s488_s3 = spop %487 }
 0x115   :  { %s68_s18 = smul.f32 0.000390625, %s488_s3 }
 0x117   :  { %70 = sst [smem:[#allocation2]] %s68_s18 }
 0x131   :  { %v160_v48 = vpop.xlane.xlu0 %159 }
 0x132   :  { %v161_v49 = vrot.slane %v160_v48, 4 }
 0x134   :  { %v162_v50 = vadd.f32 %v161_v49, %v160_v48  ;;  %v140_v30 = vpop.xlane.xlu1 %139 }
 0x135   :  { %v141_v31 = vrot.slane %v140_v30, 4  ;;  %v405_v42 = vpop.xlane.xlu0 %404 }
 0x136   :  { %v163_v51 = vrot.slane %v162_v50, 2  ;;  %v406_v52 = vrot.slane %v405_v42, 4 }
 0x137   :  { %v142_v53 = vadd.f32 %v141_v31, %v140_v30 }
 0x138   :  { %v407_v54 = vmax.f32 %v405_v42, %v406_v52  ;;  %v429_v55 = vpop.xlane.xlu1 %428  ;;  %v164_v56 = vadd.f32 %v163_v51, %v162_v50 }
 0x139   :  { %v143_v41 = vrot.slane %v142_v53, 2  ;;  %v430_v57 = vrot.slane %v429_v55, 4 }
 0x13a   :  { %v408_v58 = vrot.slane %v407_v54, 2  ;;  %v165_v60 = vrot.slane %v164_v56, 1 }
 0x13b   :  { %v431_v59 = vadd.f32 %v430_v57, %v429_v55  ;;  %v144_v0 = vadd.f32 %v143_v41, %v142_v53 }
 0x13c   :  { %v409_v8 = vmax.f32 %v407_v54, %v408_v58 }
 0x13d   :  { %v432_v61 = vrot.slane %v431_v59, 2  ;;  %v145_v62 = vrot.slane %v144_v0, 1 }
 0x13e   :  { %521 = shalt.err (!%p518_p4)
}
 0x13f   :  { %s522_s26 = scalar_lea.hbm %s864_s5, 64 }
 0x140   :  { %p523_p5 = scmp.ne.s32.totalorder %s864_s5, %s522_s26  ;;  %p526_p6 = scmp.lt.u32.totalorder %s522_s26, %s864_s5 }
 0x142   :  { %p528_p7 = pnand %p526_p6, %p523_p5 }
 0x144   :  { %531 = shalt.err (!%p528_p7)
}
 0x145   :  { %462 = dma.vmem_to_hbm [thread:$0]  %s460_s20, 64, %s864_s5, [#allocation3]   ;;  %v410_v63 = vrot.slane %v409_v8, 1 }
 0x146   :  { %s532_s8 = scalar_lea.vmem %s816_s22, 64  ;;  %p537_p9 = scmp.lt.s32.totalorder %s816_s22, %s816_s22 }
 0x147   :  { %p533_p8 = scmp.ne.s32.totalorder %s816_s22, %s532_s8  ;;  %p538_p10 = scmp.lt.s32.totalorder %s532_s8, %s532_s8 }
 0x149   :  { %p539_p11 = por %p538_p10, %p537_p9 }
 0x14b   :  { %p540_p12 = pnand %p539_p11, %p533_p8 }
 0x14d   :  { %543 = shalt.err (!%p540_p12)
}
 0x14e   :  { %s544_s11 = scalar_lea.hbm %s865_s6, 64 }
 0x14f   :  { %p545_p13 = scmp.ne.s32.totalorder %s865_s6, %s544_s11  ;;  %p548_p0 = scmp.lt.u32.totalorder %s544_s11, %s865_s6 }
 0x151   :  { %p550_p1 = pnand %p548_p0, %p545_p13 }
 0x153   :  { %553 = shalt.err (!%p550_p1)
}
 0x154   :  { %472 = dma.vmem_to_hbm [thread:$0]  %s816_s22, 64, %s865_s6, [#allocation7]   ;;  %v433_v2 = vadd.f32 %v432_v61, %v431_v59  ;;  %v146_v3 = vadd.f32 %v145_v62, %v144_v0  ;;  %v166_v4 = vadd.f32 %v165_v60, %v164_v56  ;;  %v411_v5 = vmax.f32 %v409_v8, %v410_v63 }
 0x155   :  { %s554_s28 = scalar_lea.hbm %s863_s4, 16 }
 0x156   :  { %489 = vpush %v146_v3  ;;  %v434_v38 = vrot.slane %v433_v2, 1  ;;  %p555_p2 = scmp.ne.s32.totalorder %s863_s4, %s554_s28  ;;  %p558_p3 = scmp.lt.u32.totalorder %s554_s28, %s863_s4 }
 0x157   :  { %491 = vpush %v166_v4 }
 0x158   :  { %493 = vpush %v411_v5  ;;  %v435_v43 = vadd.f32 %v434_v38, %v433_v2  ;;  %p560_p4 = pnand %p558_p3, %p555_p2 }
 0x15a   :  { %495 = vpush %v435_v43 }
 0x187   :  { %s490_s17 = spop %489 }
 0x188   :  { %s170_s0 = smul.f32 0.00083333335, %s490_s17  ;;  %s492_s2 = spop %491 }
 0x189   :  { %s173_s3 = smul.f32 0.00083333335, %s492_s2  ;;  %s494_s18 = spop %493 }
 0x18a   :  { %s437_s19 = smul.f32 %s494_s18, %s494_s18 }
 0x18b   :  { %s174_s20 = sadd.f32 %s173_s3, %s170_s0  ;;  %s496_s22 = spop %495 }
 0x18c   :  { %s438_s21 = smul.f32 512.0, %s437_s19 }
 0x18d   :  { %s175_s23 = smul.f32 2.0, %s174_s20 }
 0x18e   :  { %v439_v6 = vstv %s438_s21 }
 0x18f   :  { %s178_s6 = smul.f32 0.5, %s175_s23  ;;  %508 = vrcp.f32 %v439_v6 }
 0x191   :  { %180 = sst [smem:[#allocation2 + $0x2]] %s178_s6 }
 0x199   :  { %v509_v47 = vpop.eup %508 }
 0x19a   :  { %497 = vpush %v509_v47 }
 0x1cb   :  { %s498_s24 = spop %497 }
 0x1cc   :  { %s442_s25 = smul.f32 %s498_s24, %s496_s22 }
 0x1ce   :  { %444 = sst [smem:[#allocation2 + $0x1]] %s442_s25 }
 0x1cf   :  { %563 = shalt.err (!%p560_p4)
}
 0x1d0   :  { %s578_s8 = smov [#allocation2]  }
 0x1d1   :  { %452 = dma.smem_to_hbm %s578_s8, 16, %s863_s4, [#allocation4]  }
 0x1d2   :  { %564 = dma.done.wait [#allocation4], 16  }
 0x1d3   :  { %565 = vsyncadd [#allocation4], 4294967280 }
 0x1d4   :  { %566 = dma.done.wait [#allocation3], 64  }
 0x1d5   :  { %567 = vsyncadd [#allocation3], 4294967232 }
 0x1d6   :  { %568 = dma.done.wait [#allocation7], 64  }
 0x1d7   :  { %569 = vsyncadd [#allocation7], 4294967232 }
 0x1d8   :  { %482 = sfence }
 0x1d9   :  { %483 = vsyncpa [#allocation3], 1 }
 0x1da   :  { %484 = vsyncpa [#allocation7], 1 }
 0x1db   :  { %485 = vsyncpa [#allocation4], 1 }

</bundles_post_ra>
